<compile_context>
chip_gen: v7x
topology: tpu7x:2x2x1
jax: 0.10.0
libtpu: 0.0.40
codegen_flags: <defaults>
</compile_context>

<pallas_src>
import functools
import math

import jax
import jax.numpy as jnp
from jax.experimental import pallas as pl
from jax.experimental.pallas import tpu as pltpu


# ---------------------------------------------------------------------------
# helpers
# ---------------------------------------------------------------------------

def _pick_tile(dim, cap, base):
    """Largest tile <= cap that evenly divides dim (multiple of `base` when tiled)."""
    if dim <= cap:
        return dim
    t = (cap // base) * base
    while t >= base:
        if dim % t == 0:
            return t
        t -= base
    return dim  # nothing divides cleanly -> fall back to the full dim


def _vmem_limit(*blocks):
    """blocks: (shape, itemsize_bytes, n_buffers). Returns a vmem_limit_bytes."""
    total = 0
    for shape, itemsize, bufs in blocks:
        n = 1
        for d in shape:
            n *= d
        total += n * itemsize * bufs
    # headroom for compiler temps/spills; stay well under v7x's 64 MiB VMEM
    return int(min(max(total + (8 << 20), 16 << 20), 40 << 20))


def _activate(y, activation):
    if activation == "gelu":
        # TODO(synk): HF BERT default hidden_act is exact erf-GELU; the tanh
        # approximation is used here (Mosaic-safe elementwise ops only).
        c = math.sqrt(2.0 / math.pi)
        y = 0.5 * y * (1.0 + jnp.tanh(c * (y + 0.044715 * y * y * y)))
    elif activation == "tanh":
        y = jnp.tanh(y)
    return y


# ---------------------------------------------------------------------------
# Pallas kernels
# ---------------------------------------------------------------------------

def _matmul_kernel(x_ref, w_ref, b_ref, o_ref, *, activation):
    # Single full-K bf16 matmul, f32 accumulation, f32 epilogue.
    y = jnp.dot(x_ref[...], w_ref[...], preferred_element_type=jnp.float32)
    y = y + b_ref[...].astype(jnp.float32)
    y = _activate(y, activation)
    o_ref[...] = y.astype(o_ref.dtype)


def _matmul_ln_kernel(x_ref, w_ref, b_ref, r_ref, g_ref, bt_ref, o_ref,
                      *, activation, eps):
    """Matmul with fused bias (+activation) + residual add + LayerNorm epilogue.

    Requires tn == N so the LayerNorm reduction sees the whole row.
    """
    y = jnp.dot(x_ref[...], w_ref[...], preferred_element_type=jnp.float32)
    y = y + b_ref[...].astype(jnp.float32)
    y = _activate(y, activation)
    y = y + r_ref[...].astype(jnp.float32)
    mu = jnp.mean(y, axis=-1, keepdims=True)
    var = jnp.mean(jnp.square(y - mu), axis=-1, keepdims=True)
    y = (y - mu) * jax.lax.rsqrt(var + eps)
    y = y * g_ref[...].astype(jnp.float32) + bt_ref[...].astype(jnp.float32)
    o_ref[...] = y.astype(o_ref.dtype)


def _layernorm_kernel(x_ref, g_ref, b_ref, o_ref, *, eps):
    x = x_ref[...].astype(jnp.float32)
    mu = jnp.mean(x, axis=-1, keepdims=True)
    var = jnp.mean(jnp.square(x - mu), axis=-1, keepdims=True)
    y = (x - mu) * jax.lax.rsqrt(var + eps)
    o_ref[...] = (y * g_ref[...].astype(jnp.float32)
                  + b_ref[...].astype(jnp.float32)).astype(o_ref.dtype)


def _attention_kernel(qkv_ref, m_ref, o_ref, *, num_heads, hidden):
    """All heads of one batch element, sliced in native bf16 from fused QKV.

    1/sqrt(dh) is pre-folded into the Q projection weights; each head's context
    is stored straight into its lane slice of o_ref as it finishes (no
    concatenate, bounded live state).
    """
    m = m_ref[0].astype(jnp.float32)              # [1, S] additive key mask
    dh = hidden // num_heads
    # TODO(synk): for large S on v7x, move heads onto a grid axis (or q-tile)
    # instead of this static unrolled loop for finer 2-TC load balance.
    for h in range(num_heads):                    # static loop, static lane slices
        q = qkv_ref[0, :, h * dh:(h + 1) * dh]                              # bf16
        k = qkv_ref[0, :, hidden + h * dh:hidden + (h + 1) * dh]            # bf16
        v = qkv_ref[0, :, 2 * hidden + h * dh:2 * hidden + (h + 1) * dh]    # bf16
        s = jax.lax.dot_general(q, k, (((1,), (1,)), ((), ())),
                                preferred_element_type=jnp.float32)         # [S,S] f32
        s = s + m                                  # mask broadcasts over queries
        s = s - jnp.max(s, axis=-1, keepdims=True)
        p = jnp.exp(s)
        p = p * pl.reciprocal(jnp.sum(p, axis=-1, keepdims=True), approx=True)
        ctx = jnp.dot(p.astype(v.dtype), v, preferred_element_type=jnp.float32)
        o_ref[0, :, h * dh:(h + 1) * dh] = ctx.astype(o_ref.dtype)


# ---------------------------------------------------------------------------
# kernel wrappers
# ---------------------------------------------------------------------------

def linear(x, w, b, *, activation=None, residual=None, gamma=None, beta=None,
           eps=1e-12, tm_cap=1024, tn_cap=512):
    """y = act(x @ w + b), optionally fused with residual + LayerNorm.

    bf16 operands on the MXU, f32 accumulation/epilogue. The K axis is not
    tiled (full-K blocks) and the (K, tn) weight slab stays VMEM-resident
    across the inner M axis.
    """
    M, K = x.shape
    N = w.shape[1]
    fuse_ln = residual is not None
    if fuse_ln:
        assert gamma is not None and beta is not None

    tm = _pick_tile(M, tm_cap, 16)                 # bf16 packs 16 sublanes/vreg
    tn = N if fuse_ln else _pick_tile(N, tn_cap, 128)  # LN needs the full row
    grid = (N // tn, M // tm)                      # j outer, i inner

    b2 = b.reshape(1, N)
    x_spec = pl.BlockSpec((tm, K), lambda j, i: (i, 0))
    w_spec = pl.BlockSpec((K, tn), lambda j, i: (0, j))   # i-independent => resident
    bias_spec = pl.BlockSpec((1, tn), lambda j, i: (0, j))
    out_spec = pl.BlockSpec((tm, tn), lambda j, i: (i, j))

    vmem = _vmem_limit(((tm, K), 2, 2), ((K, tn), 2, 2), ((tm, tn), 2, 2),
                       ((tm, tn), 4, 2))           # f32 epilogue intermediates
    cp = pltpu.CompilerParams(
        dimension_semantics=("parallel", "parallel"),
        vmem_limit_bytes=vmem)

    if not fuse_ln:
        kernel = functools.partial(_matmul_kernel, activation=activation)
        return pl.pallas_call(
            kernel,
            out_shape=jax.ShapeDtypeStruct((M, N), x.dtype),
            grid=grid,
            in_specs=[x_spec, w_spec, bias_spec],
            out_specs=out_spec,
            compiler_params=cp,
        )(x, w, b2)

    kernel = functools.partial(_matmul_ln_kernel, activation=activation, eps=eps)
    in_specs = [x_spec, w_spec, bias_spec,
                pl.BlockSpec((tm, tn), lambda j, i: (i, j)),   # residual
                pl.BlockSpec((1, tn), lambda j, i: (0, j)),    # gamma
                pl.BlockSpec((1, tn), lambda j, i: (0, j))]    # beta
    return pl.pallas_call(
        kernel,
        out_shape=jax.ShapeDtypeStruct((M, N), x.dtype),
        grid=grid,
        in_specs=in_specs,
        out_specs=out_spec,
        compiler_params=cp,
    )(x, w, b2, residual, gamma.reshape(1, N), beta.reshape(1, N))


def layernorm(x, gamma, beta, eps=1e-12, out_dtype=None):
    M, H = x.shape
    if out_dtype is None:
        out_dtype = x.dtype
    tm = _pick_tile(M, 1024, 8)
    kernel = functools.partial(_layernorm_kernel, eps=eps)
    return pl.pallas_call(
        kernel,
        out_shape=jax.ShapeDtypeStruct((M, H), out_dtype),
        grid=(M // tm,),
        in_specs=[
            pl.BlockSpec((tm, H), lambda i: (i, 0)),
            pl.BlockSpec((1, H), lambda i: (0, 0)),
            pl.BlockSpec((1, H), lambda i: (0, 0)),
        ],
        out_specs=pl.BlockSpec((tm, H), lambda i: (i, 0)),
        compiler_params=pltpu.CompilerParams(
            dimension_semantics=("parallel",),
            vmem_limit_bytes=_vmem_limit(((tm, H), 4, 2), ((tm, H), 2, 2))),
    )(x, gamma.reshape(1, H), beta.reshape(1, H))


def fused_mha(qkv, mask_add, num_heads):
    """qkv: [B, S, 3H] fused projections (bf16); mask_add: [B, 1, S] additive mask."""
    B, S, H3 = qkv.shape
    H = H3 // 3
    kernel = functools.partial(_attention_kernel, num_heads=num_heads, hidden=H)
    vmem = _vmem_limit(((S, H3), 2, 2), ((1, S), 4, 2), ((S, H), 2, 2),
                       ((S, S), 4, 3))             # live f32 score/softmax tiles
    return pl.pallas_call(
        kernel,
        out_shape=jax.ShapeDtypeStruct((B, S, H), qkv.dtype),
        grid=(B,),
        in_specs=[
            pl.BlockSpec((1, S, H3), lambda b: (b, 0, 0)),
            pl.BlockSpec((1, 1, S), lambda b: (b, 0, 0)),
        ],
        out_specs=pl.BlockSpec((1, S, H), lambda b: (b, 0, 0)),
        compiler_params=pltpu.CompilerParams(
            dimension_semantics=("parallel",),
            vmem_limit_bytes=vmem),
    )(qkv, mask_add)


# ---------------------------------------------------------------------------
# Model (BertModel + pooler output), parameters initialized deterministically
# ---------------------------------------------------------------------------

def init_params(key, *, vocab_size=100, hidden_size=32, num_layers=2,
                num_heads=2, intermediate_size=64, max_position=16,
                type_vocab_size=2):
    keys = iter(jax.random.split(key, 8 + 12 * num_layers))

    def dense(k, shape):
        return jax.random.normal(k, shape, jnp.float32) * 0.02

    H, I = hidden_size, intermediate_size
    dh = H // num_heads
    q_scale = 1.0 / math.sqrt(dh)

    params = {
        "config": {"hidden_size": H, "num_heads": num_heads},
        "embeddings": {
            "word": dense(next(keys), (vocab_size, H)),
            "position": dense(next(keys), (max_position, H)),
            "token_type": dense(next(keys), (type_vocab_size, H)),
            "ln_g": jnp.ones((H,), jnp.float32),
            "ln_b": jnp.zeros((H,), jnp.float32),
        },
        "layers": [],
        # pooler stays f32 / plain JAX (tiny M = B matmul)
        "pooler_w": dense(next(keys), (H, H)),
        "pooler_b": jnp.zeros((H,), jnp.float32),
    }
    for _ in range(num_layers):
        # 1/sqrt(dh) attention scale folded into the Q projection (weights and
        # bias) so the kernel never scales the [S,S] score matrix.
        q_w = dense(next(keys), (H, H)) * q_scale
        k_w = dense(next(keys), (H, H))
        v_w = dense(next(keys), (H, H))
        q_b = jnp.zeros((H,), jnp.float32) * q_scale
        layer = {
            # fused QKV projection: one [H, 3H] bf16 matmul per layer
            "qkv_w": jnp.concatenate([q_w, k_w, v_w], axis=1).astype(jnp.bfloat16),
            "qkv_b": jnp.concatenate([q_b,
                                      jnp.zeros((H,), jnp.float32),
                                      jnp.zeros((H,), jnp.float32)]),
            "o_w": dense(next(keys), (H, H)).astype(jnp.bfloat16),
            "o_b": jnp.zeros((H,), jnp.float32),
            "ln1_g": jnp.ones((H,), jnp.float32), "ln1_b": jnp.zeros((H,), jnp.float32),
            "i_w": dense(next(keys), (H, I)).astype(jnp.bfloat16),
            "i_b": jnp.zeros((I,), jnp.float32),
            "f_w": dense(next(keys), (I, H)).astype(jnp.bfloat16),
            "f_b": jnp.zeros((H,), jnp.float32),
            "ln2_g": jnp.ones((H,), jnp.float32), "ln2_b": jnp.zeros((H,), jnp.float32),
        }
        params["layers"].append(layer)
    return params


def neural_network_forward(params, input_ids, attention_mask, token_type_ids,
                           output_way="pooler"):
    assert output_way in ("cls", "pooler")
    cfg = params["config"]
    B, S = input_ids.shape
    H = cfg["hidden_size"]
    nH = cfg["num_heads"]

    # --- embeddings: gathers + adds are glue (XLA fuses them); LN in-kernel ---
    emb = params["embeddings"]
    x_sum = (jnp.take(emb["word"], input_ids, axis=0)
             + emb["position"][None, :S, :]
             + jnp.take(emb["token_type"], token_type_ids, axis=0))      # f32 [B,S,H]
    # bf16 activations from here on; LN statistics computed in f32 in-kernel
    x = layernorm(x_sum.reshape(B * S, H), emb["ln_g"], emb["ln_b"],
                  out_dtype=jnp.bfloat16)                                # [B*S, H]

    # additive extended attention mask, as in HF BERT: (1 - mask) * -10000
    mask_add = ((1.0 - attention_mask.astype(jnp.float32)) * -10000.0)[:, None, :]

    for layer in params["layers"]:
        # --- self-attention block (fused QKV, bf16 MXU, no head transposes) ---
        qkv = linear(x, layer["qkv_w"], layer["qkv_b"])                  # bf16 [B*S, 3H]
        ctx = fused_mha(qkv.reshape(B, S, 3 * H), mask_add, nH)          # bf16 [B, S, H]
        # output projection with fused bias + residual + LayerNorm
        x = linear(ctx.reshape(B * S, H), layer["o_w"], layer["o_b"],
                   residual=x, gamma=layer["ln1_g"], beta=layer["ln1_b"])

        # --- feed-forward block (GELU fused; down-proj fused with residual+LN) ---
        h = linear(x, layer["i_w"], layer["i_b"], activation="gelu")
        x = linear(h, layer["f_w"], layer["f_b"],
                   residual=x, gamma=layer["ln2_g"], beta=layer["ln2_b"])

    cls = x.reshape(B, S, H)[:, 0, :].astype(jnp.float32)                # [B, H]
    if output_way == "cls":
        return cls
    # pooler: dense + tanh on the [CLS] token; M = B rows is far below one MXU
    # tile, so plain JAX (XLA) handles it better than a pallas_call.
    return jnp.tanh(cls @ params["pooler_w"] + params["pooler_b"])


# TODO(synk): BertModel.from_pretrained checkpoint loading / tokenization has no
# Pallas equivalent; parameters are synthetic deterministic initializations.

if __name__ == "__main__":
    B, S = 2, 8
    VOCAB = 100

    key = jax.random.PRNGKey(0)
    k_params, k_ids = jax.random.split(key)

    params = init_params(k_params, vocab_size=VOCAB, hidden_size=32,
                         num_layers=2, num_heads=2, intermediate_size=64,
                         max_position=16, type_vocab_size=2)

    input_ids = jax.random.randint(k_ids, (B, S), 0, VOCAB, dtype=jnp.int32)
    attention_mask = jnp.array(
        [[1, 1, 1, 1, 1, 1, 1, 1],
         [1, 1, 1, 1, 1, 1, 0, 0]], dtype=jnp.int32)
    token_type_ids = jnp.zeros((B, S), dtype=jnp.int32)

    out = neural_network_forward(params, input_ids, attention_mask,
                                 token_type_ids, output_way="pooler")
    out = jax.block_until_ready(out)
    assert out.shape == (B, 32), out.shape
    print("KERNEL_OK")
</pallas_src>

<mosaic_0001>
module attributes {stable_mosaic.version = 11 : i64} {
  func.func @_layernorm_kernel(%arg0: i32, %arg1: memref<16x32xf32, #tpu.memory_space<vmem>>, %arg2: memref<1x32xf32, #tpu.memory_space<vmem>>, %arg3: memref<1x32xf32, #tpu.memory_space<vmem>>, %arg4: memref<16x32xbf16, #tpu.memory_space<vmem>>) attributes {dimension_semantics = [#tpu.dimension_semantics<parallel>], iteration_bounds = array<i64: 1>, scalar_prefetch = 0 : i64, scratch_operands = 0 : i64, tpu.core_type = #tpu.core_type<tc>, window_params = [{transform_indices = @transform_0, window_bounds = array<i64: 16, 32>}, {pipeline_mode = #tpu.pipeline_mode<synchronous>, transform_indices = @transform_1, window_bounds = array<i64: 1, 32>}, {pipeline_mode = #tpu.pipeline_mode<synchronous>, transform_indices = @transform_2, window_bounds = array<i64: 1, 32>}, {transform_indices = @transform_3, window_bounds = array<i64: 16, 32>}]} {
    %c0 = arith.constant 0 : index
    %c0_0 = arith.constant 0 : index
    %0 = vector.load %arg1[%c0, %c0_0] : memref<16x32xf32, #tpu.memory_space<vmem>>, vector<16x32xf32>
    %cst = arith.constant dense<0.000000e+00> : vector<16xf32>
    %1 = vector.multi_reduction <add>, %0, %cst [1] : vector<16x32xf32> to vector<16xf32>
    %2 = vector.shape_cast %1 : vector<16xf32> to vector<16x1xf32>
    %cst_1 = arith.constant 3.200000e+01 : f32
    %3 = vector.broadcast %cst_1 : f32 to vector<16x1xf32>
    %4 = arith.divf %2, %3 : vector<16x1xf32>
    %5 = vector.broadcast %4 : vector<16x1xf32> to vector<16x32xf32>
    %6 = arith.subf %0, %5 : vector<16x32xf32>
    %7 = arith.mulf %6, %6 : vector<16x32xf32>
    %cst_2 = arith.constant dense<0.000000e+00> : vector<16xf32>
    %8 = vector.multi_reduction <add>, %7, %cst_2 [1] : vector<16x32xf32> to vector<16xf32>
    %9 = vector.shape_cast %8 : vector<16xf32> to vector<16x1xf32>
    %cst_3 = arith.constant 3.200000e+01 : f32
    %10 = vector.broadcast %cst_3 : f32 to vector<16x1xf32>
    %11 = arith.divf %9, %10 : vector<16x1xf32>
    %12 = vector.broadcast %4 : vector<16x1xf32> to vector<16x32xf32>
    %13 = arith.subf %0, %12 : vector<16x32xf32>
    %cst_4 = arith.constant 9.99999996E-13 : f32
    %14 = vector.broadcast %cst_4 : f32 to vector<16x1xf32>
    %15 = arith.addf %11, %14 : vector<16x1xf32>
    %16 = math.rsqrt %15 : vector<16x1xf32>
    %17 = vector.broadcast %16 : vector<16x1xf32> to vector<16x32xf32>
    %18 = arith.mulf %13, %17 : vector<16x32xf32>
    %c0_5 = arith.constant 0 : index
    %c0_6 = arith.constant 0 : index
    %19 = vector.load %arg2[%c0_5, %c0_6] : memref<1x32xf32, #tpu.memory_space<vmem>>, vector<1x32xf32>
    %20 = vector.broadcast %19 : vector<1x32xf32> to vector<16x32xf32>
    %21 = arith.mulf %18, %20 : vector<16x32xf32>
    %c0_7 = arith.constant 0 : index
    %c0_8 = arith.constant 0 : index
    %22 = vector.load %arg3[%c0_7, %c0_8] : memref<1x32xf32, #tpu.memory_space<vmem>>, vector<1x32xf32>
    %23 = vector.broadcast %22 : vector<1x32xf32> to vector<16x32xf32>
    %24 = arith.addf %21, %23 : vector<16x32xf32>
    %25 = arith.truncf %24 : vector<16x32xf32> to vector<16x32xbf16>
    %c0_9 = arith.constant 0 : index
    %c0_10 = arith.constant 0 : index
    %26 = vector.load %arg4[%c0_9, %c0_10] : memref<16x32xbf16, #tpu.memory_space<vmem>>, vector<16x32xbf16>
    tpu.vector_store %arg4[%c0_9, %c0_10], %25 {strides = array<i32>} : memref<16x32xbf16, #tpu.memory_space<vmem>>, vector<16x32xbf16>,
    return
  }
  func.func @transform_0(%arg0: i32) -> (i32, i32) {
    %c0_i32 = arith.constant 0 : i32
    %c0_i32_0 = arith.constant 0 : i32
    return %arg0, %c0_i32 : i32, i32
  }
  func.func @transform_1(%arg0: i32) -> (i32, i32) {
    %c0_i32 = arith.constant 0 : i32
    %c0_i32_0 = arith.constant 0 : i32
    %c0_i32_1 = arith.constant 0 : i32
    return %c0_i32, %c0_i32_0 : i32, i32
  }
  func.func @transform_2(%arg0: i32) -> (i32, i32) {
    %c0_i32 = arith.constant 0 : i32
    %c0_i32_0 = arith.constant 0 : i32
    %c0_i32_1 = arith.constant 0 : i32
    return %c0_i32, %c0_i32_0 : i32, i32
  }
  func.func @transform_3(%arg0: i32) -> (i32, i32) {
    %c0_i32 = arith.constant 0 : i32
    %c0_i32_0 = arith.constant 0 : i32
    return %arg0, %c0_i32 : i32, i32
  }
}

</mosaic_0001>

<bundles_post_ra>
// kernel: tpu_custom_call.1
= control target key start
LH: loop header
LB: loop body
LE: loop exit
PB: predicated region body
PF: predicated region fallthrough
CT: control target
= control target key end

     0   :  { %8 = vsyncpa [#allocation3], 0  ;;  %s229_s0 = inlined_call_operand.hbm [shape: f32[16,32], index: 0, kind: input, shape index: {}]   ;;  %s230_s1 = inlined_call_operand.vmem [shape: f32[1,32], index: 1, kind: input, shape index: {}]   ;;  %s231_s2 = inlined_call_operand.vmem [shape: f32[1,32], index: 2, kind: input, shape index: {}]   ;;  %s232_s3 = inlined_call_operand.hbm [shape: bf16[16,32], index: 3, kind: output, shape index: {}]  }
   0x1   :  { %9 = vsyncpa [#allocation4], 0  ;;  %s169_s12 = smov [#allocation2]   ;;  %s121_s16 = scalar_lea.hbm %s229_s0, 256 }
   0x2   :  { %s15_s13 = sshll.u32 %s169_s12, 4  ;;  %p122_p0 = scmp.ne.s32.totalorder %s229_s0, %s121_s16  ;;  %s16_s13 = int_to_ptr.vmem [resolvable:$true] %s15_s13 }
   0x3   :  { %p125_p1 = scmp.lt.u32.totalorder %s121_s16, %s229_s0 }
   0x5   :  { %p127_p2 = pnand %p125_p1, %p122_p0 }
   0x7   :  { %130 = shalt.err (!%p127_p2)
}
   0x8   :  { %s131_s21 = scalar_lea.vmem %s16_s13, 256  ;;  %p136_p4 = scmp.lt.s32.totalorder %s16_s13, %s16_s13 }
   0x9   :  { %p132_p3 = scmp.ne.s32.totalorder %s16_s13, %s131_s21  ;;  %p137_p5 = scmp.lt.s32.totalorder %s131_s21, %s131_s21 }
   0xb   :  { %p138_p6 = por %p137_p5, %p136_p4 }
   0xd   :  { %p139_p7 = pnand %p138_p6, %p132_p3 }
   0xf   :  { %142 = shalt.err (!%p139_p7)
}
  0x10   :  { %s170_s22 = smov 128   ;;  %s171_s23 = smov 8  }
  0x11   :  { %21 = dma.hbm_to_vmem [thread:$0]  %s229_s0, 256, %s16_s13, [#allocation3], %s170_s22, %s170_s22, %s171_s23  }
  0x12   :  { %165 = dma.done.wait [#allocation3], 256  }
  0x13   :  { %166 = vsyncadd [#allocation3], 4294967040  ;;  %vm31_vm0 = vcmask 261120   ;;  %v29_v0 = vld [vmem:[#allocation2] sm:$0xff]  ;;  %v30_v1 = vld [vmem:[#allocation2 + $0x8] sm:$0xff]  ;;  %vm85_vm1 = vcmask 257024  }
  0x14   :  { %v32_v2 = vsel %vm31_vm0, %v29_v0, 0.0  ;;  %v35_v3 = vsel %vm31_vm0, %v30_v1, 0.0  ;;  %v105_v21 = vld [vmem:[%s230_s1] ss:$0 sm:$0xff]  ;;  %s172_s29 = smov [#allocation5]  }
  0x15   :  { %33 = vadd.xlane.f32.xlu0 %v32_v2  ;;  %v106_v23 = vld [vmem:[%s231_s2] ss:$0 sm:$0xff]  ;;  %s93_s30 = sshll.u32 %s172_s29, 4  ;;  %s94_s30 = int_to_ptr.vmem [resolvable:$true] %s93_s30 }
  0x16   :  { %s143_s1 = scalar_lea.vmem %s94_s30, 128  ;;  %p148_p9 = scmp.lt.s32.totalorder %s94_s30, %s94_s30 }
  0x17   :  { %p144_p8 = scmp.ne.s32.totalorder %s94_s30, %s143_s1  ;;  %p149_p10 = scmp.lt.s32.totalorder %s143_s1, %s143_s1 }
  0x19   :  { %36 = vadd.xlane.f32.xlu0 %v35_v3  ;;  %p150_p11 = por %p149_p10, %p148_p9 }
  0x1b   :  { %p151_p12 = pnand %p150_p11, %p144_p8 }
  0xa2   :  { %v34_v4 = vpop.xlane.xlu0 %33 }
  0xa3   :  { %v39_v5 = vmul.f32 0.03125, %v34_v4 }
  0xa5   :  { %v41_v6 = vsub.f32 %v29_v0, %v39_v5 }
  0xa6   :  { %v37_v7 = vpop.xlane.xlu0 %36 }
  0xa7   :  { %v40_v8 = vmul.f32 0.03125, %v37_v7  ;;  %v43_v9 = vmul.f32 %v41_v6, %v41_v6 }
  0xa9   :  { %v42_v10 = vsub.f32 %v30_v1, %v40_v8  ;;  %v45_v11 = vsel %vm31_vm0, %v43_v9, 0.0 }
  0xaa   :  { %46 = vadd.xlane.f32.xlu1 %v45_v11 }
  0xab   :  { %v44_v12 = vmul.f32 %v42_v10, %v42_v10 }
  0xad   :  { %v48_v13 = vsel %vm31_vm0, %v44_v12, 0.0 }
  0xae   :  { %49 = vadd.xlane.f32.xlu1 %v48_v13 }
 0x137   :  { %v47_v14 = vpop.xlane.xlu1 %46 }
 0x138   :  { %v51_v15 = vmul.f32 0.03125, %v47_v14 }
 0x13a   :  { %v53_v16 = vadd.f32 1e-12, %v51_v15 }
 0x13b   :  { %v50_v17 = vpop.xlane.xlu1 %49 }
 0x13c   :  { %117 = vrsqrt.f32 %v53_v16  ;;  %v52_v18 = vmul.f32 0.03125, %v50_v17 }
 0x13e   :  { %v54_v19 = vadd.f32 1e-12, %v52_v18 }
 0x140   :  { %119 = vrsqrt.f32 %v54_v19 }
 0x146   :  { %v118_v20 = vpop.eup %117 }
 0x147   :  { %v57_v22 = vmul.f32 %v118_v20, %v41_v6 }
 0x149   :  { %v66_v24 = vmul.f32 %v105_v21, %v57_v22 }
 0x14a   :  { %v120_v25 = vpop.eup %119 }
 0x14b   :  { %v58_v26 = vmul.f32 %v120_v25, %v42_v10  ;;  %v75_v27 = vadd.f32 %v106_v23, %v66_v24 }
 0x14d   :  { %v67_v28 = vmul.f32 %v105_v21, %v58_v26  ;;  %v109_v29 = vpack.c.bf16 %v75_v27, %v75_v27 }
 0x14f   :  { %v76_v30 = vadd.f32 %v106_v23, %v67_v28  ;;  %86 = vst.msk [vmem:[#allocation5] sm:$0xf] %vm85_vm1, %v109_v29 }
 0x151   :  { %v110_v31 = vpack.c.bf16 %v76_v30, %v76_v30 }
 0x153   :  { %87 = vst.msk [vmem:[#allocation5 + $0x4] sm:$0xf] %vm85_vm1, %v110_v31 }
 0x154   :  { %154 = shalt.err (!%p151_p12)
}
 0x155   :  { %s155_s5 = scalar_lea.hbm %s232_s3, 128 }
 0x156   :  { %p156_p13 = scmp.ne.s32.totalorder %s232_s3, %s155_s5  ;;  %p159_p0 = scmp.lt.u32.totalorder %s155_s5, %s232_s3 }
 0x158   :  { %p161_p1 = pnand %p159_p0, %p156_p13 }
 0x15a   :  { %164 = shalt.err (!%p161_p1)
}
 0x15b   :  { %s173_s10 = smov 64   ;;  %s174_s11 = smov 4  }
 0x15c   :  { %99 = dma.vmem_to_hbm [thread:$0]  %s94_s30, 128, %s232_s3, [#allocation4], %s173_s10, %s173_s10, %s174_s11  }
 0x15d   :  { %167 = dma.done.wait [#allocation4], 128  }
 0x15e   :  { %168 = vsyncadd [#allocation4], 4294967168 }
 0x15f   :  { %103 = vsyncpa [#allocation3], 1 }
 0x160   :  { %104 = vsyncpa [#allocation4], 1 }

</bundles_post_ra>
